<compile_context>
chip_gen: v5e
topology: v5e:2x2
jax: 0.10.0
libtpu: 0.0.40
codegen_flags: <defaults>
</compile_context>

<pallas_src>
import functools

import jax
import jax.numpy as jnp
from jax.experimental import pallas as pl
from jax.experimental.pallas import tpu as pltpu


def calculate_laplacian_with_self_loop(adj):
    """D^{-1/2} (A + I) D^{-1/2} with D from row-sums of (A + I)."""
    a = adj + jnp.eye(adj.shape[0], dtype=adj.dtype)
    row_sum = a.sum(axis=1)
    d_inv_sqrt = jnp.power(row_sum, -0.5)
    d_inv_sqrt = jnp.where(jnp.isinf(d_inv_sqrt), 0.0, d_inv_sqrt)
    d_mat = jnp.diag(d_inv_sqrt)
    return d_mat @ a @ d_mat


def _tgcn_cell_kernel(x_ref, h_ref, lap_ref, w1x_ref, w1h_ref, b1_ref,
                      w2x_ref, w2h_ref, b2_ref, out_ref, *,
                      batch, num_nodes, hidden_dim):
    """Whole TGCN cell for all batches in one invocation.

    x_ref  : (B*N, C)   flattened inputs
    h_ref  : (B*N, H)   flattened hidden state
    lap    : (N, N)     normalized laplacian
    W1x/W1h/b1, W2x/W2h/b2 : split graph-conv parameters
    out    : (B*N, H)   new hidden state (flattened)
    """
    lap = lap_ref[...]            # (N, N)
    h = h_ref[...]                # (B*N, H)

    def lap_apply(rows_fn):
        # Apply the (N, N) laplacian per batch block and stack along rows.
        # Row offsets are static multiples of N (N is a multiple of 8), so the
        # axis-0 concatenation is a cheap, tile-aligned sublane stack.
        blocks = []
        for b in range(batch):
            lo, hi = b * num_nodes, (b + 1) * num_nodes
            blocks.append(jnp.dot(lap, rows_fn(lo, hi),
                                  preferred_element_type=jnp.float32))
        return jnp.concatenate(blocks, axis=0)

    # L @ x and L @ h, computed once.  Lx is reused by both graph convs.
    lx = lap_apply(lambda lo, hi: x_ref[lo:hi, :])      # (B*N, C)
    lh = lap_apply(lambda lo, hi: h_ref[lo:hi, :])      # (B*N, H)

    # graph_conv1: sigmoid(L @ [x, h] @ W1 + b1) == sigmoid(Lx@W1x + Lh@W1h + b1)
    g1 = jax.nn.sigmoid(
        jnp.dot(lx, w1x_ref[...], preferred_element_type=jnp.float32)
        + jnp.dot(lh, w1h_ref[...], preferred_element_type=jnp.float32)
        + b1_ref[...])                                   # (B*N, 2H)

    r = g1[:, :hidden_dim]                               # reset gate  (B*N, H)
    u = g1[:, hidden_dim:]                               # update gate (B*N, H)

    # graph_conv2: tanh(L @ [x, r*h] @ W2 + b2) == tanh(Lx@W2x + L@(r*h)@W2h + b2)
    rh = r * h
    lrh = lap_apply(lambda lo, hi: rh[lo:hi, :])         # (B*N, H)
    c = jnp.tanh(
        jnp.dot(lx, w2x_ref[...], preferred_element_type=jnp.float32)
        + jnp.dot(lrh, w2h_ref[...], preferred_element_type=jnp.float32)
        + b2_ref[...])                                   # (B*N, H)

    # GRU-style state update, one lane-dense slab store.
    out_ref[...] = u * h + (1.0 - u) * c


def tgcn_cell_forward(inputs, hidden_state, laplacian, w1, b1, w2, b2):
    """Pallas TGCNCell forward. Returns (new_hidden, new_hidden)."""
    B, N, C = inputs.shape
    H = hidden_state.shape[-1]

    # Flatten batch into rows so the weight matmuls run over B*N rows at once.
    x_flat = inputs.reshape(B * N, C).astype(jnp.float32)
    h_flat = hidden_state.reshape(B * N, H).astype(jnp.float32)

    # Split weights along the contraction dim -> no in-kernel concatenation.
    w1x, w1h = w1[:C], w1[C:]           # (C, 2H), (H, 2H)
    w2x, w2h = w2[:C], w2[C:]           # (C, H),  (H, H)
    b1_2d = b1.reshape(1, 2 * H)
    b2_2d = b2.reshape(1, H)

    kernel = functools.partial(_tgcn_cell_kernel,
                               batch=B, num_nodes=N, hidden_dim=H)

    lap_flops = 2 * B * N * N * (C + 2 * H)                       # L@x, L@h, L@(r*h)
    w_flops = 2 * B * N * (C * 2 * H + H * 2 * H + C * H + H * H)  # weight matmuls
    cost = pl.CostEstimate(
        flops=lap_flops + w_flops,
        transcendentals=B * N * 3 * H,  # sigmoid(2H) + tanh(H) per row
        bytes_accessed=4 * (x_flat.size + h_flat.size + laplacian.size
                            + w1.size + b1.size + w2.size + b2.size
                            + B * N * H))

    new_h_flat = pl.pallas_call(
        kernel,
        out_shape=jax.ShapeDtypeStruct((B * N, H), jnp.float32),
        grid_spec=pl.GridSpec(
            grid=(1,),                                    # single step: no per-batch
            in_specs=[                                    # pipeline / DMA overhead
                pl.BlockSpec((B * N, C), lambda i: (0, 0)),       # x (flattened)
                pl.BlockSpec((B * N, H), lambda i: (0, 0)),       # h (flattened)
                pl.BlockSpec((N, N), lambda i: (0, 0)),           # laplacian
                pl.BlockSpec((C, 2 * H), lambda i: (0, 0)),       # W1x
                pl.BlockSpec((H, 2 * H), lambda i: (0, 0)),       # W1h
                pl.BlockSpec((1, 2 * H), lambda i: (0, 0)),       # b1
                pl.BlockSpec((C, H), lambda i: (0, 0)),           # W2x
                pl.BlockSpec((H, H), lambda i: (0, 0)),           # W2h
                pl.BlockSpec((1, H), lambda i: (0, 0)),           # b2
            ],
            out_specs=pl.BlockSpec((B * N, H), lambda i: (0, 0)),
        ),
        compiler_params=pltpu.CompilerParams(
            dimension_semantics=("arbitrary",)),
        cost_estimate=cost,
    )(x_flat, h_flat, laplacian, w1x, w1h, b1_2d, w2x, w2h, b2_2d)

    new_h = new_h_flat.reshape(B, N, H)
    return new_h, new_h


def _reference_forward(inputs, hidden_state, laplacian, w1, b1, w2, b2):
    """Pure-JAX reference mirroring the PyTorch module semantics."""
    hp = jax.lax.Precision.HIGHEST
    H = hidden_state.shape[-1]
    cat1 = jnp.concatenate([inputs, hidden_state], axis=2)
    a1 = jnp.einsum("nm,bmk->bnk", laplacian, cat1, precision=hp)
    g1 = jax.nn.sigmoid(jnp.einsum("bnk,ko->bno", a1, w1, precision=hp) + b1)
    r, u = g1[..., :H], g1[..., H:]
    cat2 = jnp.concatenate([inputs, r * hidden_state], axis=2)
    a2 = jnp.einsum("nm,bmk->bnk", laplacian, cat2, precision=hp)
    c = jnp.tanh(jnp.einsum("bnk,ko->bno", a2, w2, precision=hp) + b2)
    return u * hidden_state + (1.0 - u) * c


def _xavier_uniform(key, shape):
    fan_in, fan_out = shape
    limit = jnp.sqrt(6.0 / (fan_in + fan_out))
    return jax.random.uniform(key, shape, jnp.float32, -limit, limit)


if __name__ == "__main__":
    # Small deterministic setup: batch=2, num_nodes=16, in_channels=4, hidden=32.
    B, N, C, H = 2, 16, 4, 32

    key = jax.random.PRNGKey(0)
    k_adj, k_x, k_h, k_w1, k_w2 = jax.random.split(key, 5)

    # Synthetic symmetric binary adjacency (deterministic).
    adj_raw = (jax.random.uniform(k_adj, (N, N)) > 0.7).astype(jnp.float32)
    adj = jnp.maximum(adj_raw, adj_raw.T) * (1.0 - jnp.eye(N, dtype=jnp.float32))
    laplacian = calculate_laplacian_with_self_loop(adj)

    # Parameters (Xavier-uniform weights; graph_conv1 bias=1.0, graph_conv2 bias=0.0).
    w1 = _xavier_uniform(k_w1, (C + H, 2 * H))
    b1 = jnp.full((2 * H,), 1.0, dtype=jnp.float32)
    w2 = _xavier_uniform(k_w2, (C + H, H))
    b2 = jnp.zeros((H,), dtype=jnp.float32)

    inputs = jax.random.normal(k_x, (B, N, C), dtype=jnp.float32)
    hidden = jax.random.normal(k_h, (B, N, H), dtype=jnp.float32)

    new_h, out = tgcn_cell_forward(inputs, hidden, laplacian, w1, b1, w2, b2)
    new_h = jax.block_until_ready(new_h)

    ref = _reference_forward(inputs, hidden, laplacian, w1, b1, w2, b2)
    assert new_h.shape == (B, N, H)
    assert jnp.allclose(new_h, ref, atol=1e-4, rtol=1e-4), "mismatch vs reference"

    print("KERNEL_OK")
</pallas_src>

<mosaic_0001>
module attributes {stable_mosaic.version = 11 : i64} {
  func.func @_tgcn_cell_kernel(%arg0: i32, %arg1: memref<32x4xf32, #tpu.memory_space<vmem>>, %arg2: memref<32x32xf32, #tpu.memory_space<vmem>>, %arg3: memref<16x16xf32, #tpu.memory_space<vmem>>, %arg4: memref<4x64xf32, #tpu.memory_space<vmem>>, %arg5: memref<32x64xf32, #tpu.memory_space<vmem>>, %arg6: memref<1x64xf32, #tpu.memory_space<vmem>>, %arg7: memref<4x32xf32, #tpu.memory_space<vmem>>, %arg8: memref<32x32xf32, #tpu.memory_space<vmem>>, %arg9: memref<1x32xf32, #tpu.memory_space<vmem>>, %arg10: memref<32x32xf32, #tpu.memory_space<vmem>>) attributes {dimension_semantics = [#tpu.dimension_semantics<arbitrary>], iteration_bounds = array<i64: 1>, scalar_prefetch = 0 : i64, scratch_operands = 0 : i64, tpu.core_type = #tpu.core_type<tc>, window_params = [{pipeline_mode = #tpu.pipeline_mode<synchronous>, transform_indices = @transform_0, window_bounds = array<i64: 32, 4>}, {pipeline_mode = #tpu.pipeline_mode<synchronous>, transform_indices = @transform_1, window_bounds = array<i64: 32, 32>}, {pipeline_mode = #tpu.pipeline_mode<synchronous>, transform_indices = @transform_2, window_bounds = array<i64: 16, 16>}, {pipeline_mode = #tpu.pipeline_mode<synchronous>, transform_indices = @transform_3, window_bounds = array<i64: 4, 64>}, {pipeline_mode = #tpu.pipeline_mode<synchronous>, transform_indices = @transform_4, window_bounds = array<i64: 32, 64>}, {pipeline_mode = #tpu.pipeline_mode<synchronous>, transform_indices = @transform_5, window_bounds = array<i64: 1, 64>}, {pipeline_mode = #tpu.pipeline_mode<synchronous>, transform_indices = @transform_6, window_bounds = array<i64: 4, 32>}, {pipeline_mode = #tpu.pipeline_mode<synchronous>, transform_indices = @transform_7, window_bounds = array<i64: 32, 32>}, {pipeline_mode = #tpu.pipeline_mode<synchronous>, transform_indices = @transform_8, window_bounds = array<i64: 1, 32>}, {pipeline_mode = #tpu.pipeline_mode<synchronous>, transform_indices = @transform_9, window_bounds = array<i64: 32, 32>}]} {
    %c0 = arith.constant 0 : index
    %c0_0 = arith.constant 0 : index
    %0 = vector.load %arg3[%c0, %c0_0] : memref<16x16xf32, #tpu.memory_space<vmem>>, vector<16x16xf32>
    %c0_1 = arith.constant 0 : index
    %c0_2 = arith.constant 0 : index
    %1 = vector.load %arg2[%c0_1, %c0_2] : memref<32x32xf32, #tpu.memory_space<vmem>>, vector<32x32xf32>
    %c0_3 = arith.constant 0 : index
    %c0_4 = arith.constant 0 : index
    %2 = vector.load %arg1[%c0_3, %c0_4] : memref<32x4xf32, #tpu.memory_space<vmem>>, vector<16x4xf32>
    %cst = arith.constant dense<0.000000e+00> : vector<16x4xf32>
    %3 = tpu.matmul %0, %2, %cst {dimension_numbers = #tpu.dot_dimension_numbers<[1], [0], [0], [1], [0, 0, 1, 1], [], []>} : vector<16x16xf32>, vector<16x4xf32>, vector<16x4xf32> -> vector<16x4xf32>
    %c16 = arith.constant 16 : index
    %c0_5 = arith.constant 0 : index
    %4 = vector.load %arg1[%c16, %c0_5] : memref<32x4xf32, #tpu.memory_space<vmem>>, vector<16x4xf32>
    %cst_6 = arith.constant dense<0.000000e+00> : vector<16x4xf32>
    %5 = tpu.matmul %0, %4, %cst_6 {dimension_numbers = #tpu.dot_dimension_numbers<[1], [0], [0], [1], [0, 0, 1, 1], [], []>} : vector<16x16xf32>, vector<16x4xf32>, vector<16x4xf32> -> vector<16x4xf32>
    %6 = tpu.concatenate %3, %5 in 0 : vector<16x4xf32>, vector<16x4xf32> -> vector<32x4xf32>
    %c0_7 = arith.constant 0 : index
    %c0_8 = arith.constant 0 : index
    %7 = vector.load %arg2[%c0_7, %c0_8] : memref<32x32xf32, #tpu.memory_space<vmem>>, vector<16x32xf32>
    %cst_9 = arith.constant dense<0.000000e+00> : vector<16x32xf32>
    %8 = tpu.matmul %0, %7, %cst_9 {dimension_numbers = #tpu.dot_dimension_numbers<[1], [0], [0], [1], [0, 0, 1, 1], [], []>} : vector<16x16xf32>, vector<16x32xf32>, vector<16x32xf32> -> vector<16x32xf32>
    %c16_10 = arith.constant 16 : index
    %c0_11 = arith.constant 0 : index
    %9 = vector.load %arg2[%c16_10, %c0_11] : memref<32x32xf32, #tpu.memory_space<vmem>>, vector<16x32xf32>
    %cst_12 = arith.constant dense<0.000000e+00> : vector<16x32xf32>
    %10 = tpu.matmul %0, %9, %cst_12 {dimension_numbers = #tpu.dot_dimension_numbers<[1], [0], [0], [1], [0, 0, 1, 1], [], []>} : vector<16x16xf32>, vector<16x32xf32>, vector<16x32xf32> -> vector<16x32xf32>
    %11 = tpu.concatenate %8, %10 in 0 : vector<16x32xf32>, vector<16x32xf32> -> vector<32x32xf32>
    %c0_13 = arith.constant 0 : index
    %c0_14 = arith.constant 0 : index
    %12 = vector.load %arg4[%c0_13, %c0_14] : memref<4x64xf32, #tpu.memory_space<vmem>>, vector<4x64xf32>
    %cst_15 = arith.constant dense<0.000000e+00> : vector<32x64xf32>
    %13 = tpu.matmul %6, %12, %cst_15 {dimension_numbers = #tpu.dot_dimension_numbers<[1], [0], [0], [1], [0, 0, 1, 1], [], []>} : vector<32x4xf32>, vector<4x64xf32>, vector<32x64xf32> -> vector<32x64xf32>
    %c0_16 = arith.constant 0 : index
    %c0_17 = arith.constant 0 : index
    %14 = vector.load %arg5[%c0_16, %c0_17] : memref<32x64xf32, #tpu.memory_space<vmem>>, vector<32x64xf32>
    %cst_18 = arith.constant dense<0.000000e+00> : vector<32x64xf32>
    %15 = tpu.matmul %11, %14, %cst_18 {dimension_numbers = #tpu.dot_dimension_numbers<[1], [0], [0], [1], [0, 0, 1, 1], [], []>} : vector<32x32xf32>, vector<32x64xf32>, vector<32x64xf32> -> vector<32x64xf32>
    %16 = arith.addf %13, %15 : vector<32x64xf32>
    %c0_19 = arith.constant 0 : index
    %c0_20 = arith.constant 0 : index
    %17 = vector.load %arg6[%c0_19, %c0_20] : memref<1x64xf32, #tpu.memory_space<vmem>>, vector<1x64xf32>
    %18 = vector.broadcast %17 : vector<1x64xf32> to vector<32x64xf32>
    %19 = arith.addf %16, %18 : vector<32x64xf32>
    %20 = arith.negf %19 : vector<32x64xf32>
    %21 = math.exp %20 : vector<32x64xf32>
    %cst_21 = arith.constant 1.000000e+00 : f32
    %22 = vector.broadcast %cst_21 : f32 to vector<32x64xf32>
    %23 = arith.addf %22, %21 : vector<32x64xf32>
    %24 = arith.divf %22, %23 : vector<32x64xf32>
    %25 = vector.extract_strided_slice %24 {offsets = [0, 0], sizes = [32, 32], strides = [1, 1]} : vector<32x64xf32> to vector<32x32xf32>
    %26 = vector.extract_strided_slice %24 {offsets = [0, 32], sizes = [32, 32], strides = [1, 1]} : vector<32x64xf32> to vector<32x32xf32>
    %27 = arith.mulf %25, %1 : vector<32x32xf32>
    %28 = vector.extract_strided_slice %27 {offsets = [0, 0], sizes = [16, 32], strides = [1, 1]} : vector<32x32xf32> to vector<16x32xf32>
    %cst_22 = arith.constant dense<0.000000e+00> : vector<16x32xf32>
    %29 = tpu.matmul %0, %28, %cst_22 {dimension_numbers = #tpu.dot_dimension_numbers<[1], [0], [0], [1], [0, 0, 1, 1], [], []>} : vector<16x16xf32>, vector<16x32xf32>, vector<16x32xf32> -> vector<16x32xf32>
    %30 = vector.extract_strided_slice %27 {offsets = [16, 0], sizes = [16, 32], strides = [1, 1]} : vector<32x32xf32> to vector<16x32xf32>
    %cst_23 = arith.constant dense<0.000000e+00> : vector<16x32xf32>
    %31 = tpu.matmul %0, %30, %cst_23 {dimension_numbers = #tpu.dot_dimension_numbers<[1], [0], [0], [1], [0, 0, 1, 1], [], []>} : vector<16x16xf32>, vector<16x32xf32>, vector<16x32xf32> -> vector<16x32xf32>
    %32 = tpu.concatenate %29, %31 in 0 : vector<16x32xf32>, vector<16x32xf32> -> vector<32x32xf32>
    %c0_24 = arith.constant 0 : index
    %c0_25 = arith.constant 0 : index
    %33 = vector.load %arg7[%c0_24, %c0_25] : memref<4x32xf32, #tpu.memory_space<vmem>>, vector<4x32xf32>
    %cst_26 = arith.constant dense<0.000000e+00> : vector<32x32xf32>
    %34 = tpu.matmul %6, %33, %cst_26 {dimension_numbers = #tpu.dot_dimension_numbers<[1], [0], [0], [1], [0, 0, 1, 1], [], []>} : vector<32x4xf32>, vector<4x32xf32>, vector<32x32xf32> -> vector<32x32xf32>
    %c0_27 = arith.constant 0 : index
    %c0_28 = arith.constant 0 : index
    %35 = vector.load %arg8[%c0_27, %c0_28] : memref<32x32xf32, #tpu.memory_space<vmem>>, vector<32x32xf32>
    %cst_29 = arith.constant dense<0.000000e+00> : vector<32x32xf32>
    %36 = tpu.matmul %32, %35, %cst_29 {dimension_numbers = #tpu.dot_dimension_numbers<[1], [0], [0], [1], [0, 0, 1, 1], [], []>} : vector<32x32xf32>, vector<32x32xf32>, vector<32x32xf32> -> vector<32x32xf32>
    %37 = arith.addf %34, %36 : vector<32x32xf32>
    %c0_30 = arith.constant 0 : index
    %c0_31 = arith.constant 0 : index
    %38 = vector.load %arg9[%c0_30, %c0_31] : memref<1x32xf32, #tpu.memory_space<vmem>>, vector<1x32xf32>
    %39 = vector.broadcast %38 : vector<1x32xf32> to vector<32x32xf32>
    %40 = arith.addf %37, %39 : vector<32x32xf32>
    %41 = math.tanh %40 : vector<32x32xf32>
    %42 = arith.mulf %26, %1 : vector<32x32xf32>
    %cst_32 = arith.constant 1.000000e+00 : f32
    %43 = vector.broadcast %cst_32 : f32 to vector<32x32xf32>
    %44 = arith.subf %43, %26 : vector<32x32xf32>
    %45 = arith.mulf %44, %41 : vector<32x32xf32>
    %46 = arith.addf %42, %45 : vector<32x32xf32>
    %c0_33 = arith.constant 0 : index
    %c0_34 = arith.constant 0 : index
    %47 = vector.load %arg10[%c0_33, %c0_34] : memref<32x32xf32, #tpu.memory_space<vmem>>, vector<32x32xf32>
    tpu.vector_store %arg10[%c0_33, %c0_34], %46 {strides = array<i32>} : memref<32x32xf32, #tpu.memory_space<vmem>>, vector<32x32xf32>,
    return
  }
  func.func @transform_0(%arg0: i32) -> (i32, i32) {
    %c0_i32 = arith.constant 0 : i32
    %c0_i32_0 = arith.constant 0 : i32
    %c0_i32_1 = arith.constant 0 : i32
    return %c0_i32, %c0_i32_0 : i32, i32
  }
  func.func @transform_1(%arg0: i32) -> (i32, i32) {
    %c0_i32 = arith.constant 0 : i32
    %c0_i32_0 = arith.constant 0 : i32
    %c0_i32_1 = arith.constant 0 : i32
    return %c0_i32, %c0_i32_0 : i32, i32
  }
  func.func @transform_2(%arg0: i32) -> (i32, i32) {
    %c0_i32 = arith.constant 0 : i32
    %c0_i32_0 = arith.constant 0 : i32
    %c0_i32_1 = arith.constant 0 : i32
    return %c0_i32, %c0_i32_0 : i32, i32
  }
  func.func @transform_3(%arg0: i32) -> (i32, i32) {
    %c0_i32 = arith.constant 0 : i32
    %c0_i32_0 = arith.constant 0 : i32
    %c0_i32_1 = arith.constant 0 : i32
    return %c0_i32, %c0_i32_0 : i32, i32
  }
  func.func @transform_4(%arg0: i32) -> (i32, i32) {
    %c0_i32 = arith.constant 0 : i32
    %c0_i32_0 = arith.constant 0 : i32
    %c0_i32_1 = arith.constant 0 : i32
    return %c0_i32, %c0_i32_0 : i32, i32
  }
  func.func @transform_5(%arg0: i32) -> (i32, i32) {
    %c0_i32 = arith.constant 0 : i32
    %c0_i32_0 = arith.constant 0 : i32
    %c0_i32_1 = arith.constant 0 : i32
    return %c0_i32, %c0_i32_0 : i32, i32
  }
  func.func @transform_6(%arg0: i32) -> (i32, i32) {
    %c0_i32 = arith.constant 0 : i32
    %c0_i32_0 = arith.constant 0 : i32
    %c0_i32_1 = arith.constant 0 : i32
    return %c0_i32, %c0_i32_0 : i32, i32
  }
  func.func @transform_7(%arg0: i32) -> (i32, i32) {
    %c0_i32 = arith.constant 0 : i32
    %c0_i32_0 = arith.constant 0 : i32
    %c0_i32_1 = arith.constant 0 : i32
    return %c0_i32, %c0_i32_0 : i32, i32
  }
  func.func @transform_8(%arg0: i32) -> (i32, i32) {
    %c0_i32 = arith.constant 0 : i32
    %c0_i32_0 = arith.constant 0 : i32
    %c0_i32_1 = arith.constant 0 : i32
    return %c0_i32, %c0_i32_0 : i32, i32
  }
  func.func @transform_9(%arg0: i32) -> (i32, i32) {
    %c0_i32 = arith.constant 0 : i32
    %c0_i32_0 = arith.constant 0 : i32
    %c0_i32_1 = arith.constant 0 : i32
    return %c0_i32, %c0_i32_0 : i32, i32
  }
}

</mosaic_0001>

<bundles_post_ra>
// kernel: tpu_custom_call.1
= control target key start
LH: loop header
LB: loop body
LE: loop exit
PB: predicated region body
PF: predicated region fallthrough
CT: control target
= control target key end

     0   :  { %14 = vsyncpa [#allocation3], 0  ;;  %s1055_s0 = inlined_call_operand.vmem [shape: f32[32,4], index: 0, kind: input, shape index: {}]   ;;  %s1056_s1 = inlined_call_operand.vmem [shape: f32[32,32], index: 1, kind: input, shape index: {}]   ;;  %s1057_s2 = inlined_call_operand.hbm [shape: f32[16,16], index: 2, kind: input, shape index: {}]   ;;  %s1058_s3 = inlined_call_operand.vmem [shape: f32[4,64], index: 3, kind: input, shape index: {}]   ;;  %s1059_s4 = inlined_call_operand.hbm [shape: f32[32,64], index: 4, kind: input, shape index: {}]   ;;  %s1060_s5 = inlined_call_operand.hbm [shape: f32[1,64], index: 5, kind: input, shape index: {}]   ;;  %s1061_s6 = inlined_call_operand.vmem [shape: f32[4,32], index: 6, kind: input, shape index: {}]   ;;  %s1062_s7 = inlined_call_operand.hbm [shape: f32[32,32], index: 7, kind: input, shape index: {}]   ;;  %s1063_s8 = inlined_call_operand.vmem [shape: f32[1,32], index: 8, kind: input, shape index: {}]   ;;  %s1064_s9 = inlined_call_operand.hbm [shape: f32[32,32], index: 9, kind: output, shape index: {}]  }
   0x1   :  { %15 = vsyncpa [#allocation6], 0 }
   0x2   :  { %16 = vsyncpa [#allocation9], 0 }
   0x3   :  { %17 = vsyncpa [#allocation4], 0  ;;  %s41_s11 = sshll.u32 %s1059_s4, 4  ;;  %s812_s12 = smov [#allocation5]   ;;  %s42_s11 = int_to_ptr.hbm [resolvable:$true] %s41_s11 }
   0x4   :  { %s43_s13 = sshll.u32 %s812_s12, 4  ;;  %s26_s16 = sshll.u32 %s1057_s2, 4  ;;  %s44_s13 = int_to_ptr.vmem [resolvable:$true] %s43_s13  ;;  %s27_s16 = int_to_ptr.hbm [resolvable:$true] %s26_s16 }
   0x5   :  { %s813_s17 = smov 128   ;;  %s814_s18 = smov 8  }
   0x6   :  { %49 = dma.hbm_to_vmem [thread:$0]  %s42_s11, 512, %s44_s13, [#allocation6], %s813_s17, %s813_s17, %s814_s18  }
   0x7   :  { %s815_s19 = smov [#allocation2]   ;;  %s55_s4 = sshll.u32 %s1060_s5, 4  ;;  %s56_s4 = int_to_ptr.hbm [resolvable:$true] %s55_s4 }
   0x8   :  { %s28_s20 = sshll.u32 %s815_s19, 4  ;;  %s67_s24 = sshll.u32 %s1062_s7, 4  ;;  %s29_s20 = int_to_ptr.vmem [resolvable:$true] %s28_s20  ;;  %s68_s24 = int_to_ptr.hbm [resolvable:$true] %s67_s24 }
   0x9   :  { %34 = dma.hbm_to_vmem [thread:$0]  %s27_s16, 256, %s29_s20, [#allocation3], %s813_s17, %s813_s17, %s814_s18  }
   0xa   :  { %s816_s25 = smov [#allocation7]   ;;  %s817_s27 = smov [#allocation8]  }
   0xb   :  { %s57_s26 = sshll.u32 %s816_s25, 4  ;;  %s69_s28 = sshll.u32 %s817_s27, 4  ;;  %s58_s26 = int_to_ptr.vmem [resolvable:$true] %s57_s26  ;;  %s70_s28 = int_to_ptr.vmem [resolvable:$true] %s69_s28 }
   0xc   :  { %60 = dma.hbm_to_vmem [thread:$0]  %s56_s4, 16, %s58_s26, [#allocation6]  }
   0xd   :  { %75 = dma.hbm_to_vmem [thread:$0]  %s68_s24, 512, %s70_s28, [#allocation9], %s813_s17, %s813_s17, %s814_s18  }
   0xe   :  { %804 = dma.done.wait [#allocation3], 256  }
   0xf   :  { %805 = vsyncadd [#allocation3], 4294967040 }
  0x10   :  { %806 = dma.done.wait [#allocation6], 528  }
  0x11   :  { %807 = vsyncadd [#allocation6], 4294966768 }
  0x12   :  { %808 = dma.done.wait [#allocation9], 512  }
  0x13   :  { %809 = vsyncadd [#allocation9], 4294966784  ;;  %v101_v0 = vld [vmem:[%s1055_s0 + $0x8] sm:$0xff]  ;;  %v100_v1 = vld [vmem:[%s1055_s0] sm:$0xff]  ;;  %vm102_vm0 = vcmask 130048   ;;  %vm265_vm1 = vcmask 1043456  }
  0x14   :  { %123 = vmatpush.msra.mxu0 %v101_v0  ;;  %v898_v2 = vld [vmem:[#allocation2] sm:$0xff]  ;;  %v903_v3 = vld [vmem:[%s1056_s1 + $0x8] sm:$0xff]  ;;  %v133_v4 = vld [vmem:[%s1055_s0 + $0x18] sm:$0xff]  ;;  %vm252_vm2 = vcmask 31744   ;;  %vm210_vm3 = vcmask 261120   ;;  %s820_s25 = smov [#allocation10]  }
  0x15   :  { %148 = vmatpush.msra.mxu1 %v133_v4  ;;  %v132_v5 = vld [vmem:[%s1055_s0 + $0x10] sm:$0xff]  ;;  %645 = vmatpush.msra.mxu2 %v903_v3  ;;  %v915_v6 = vld [vmem:[%s1056_s1 + $0x18] sm:$0xff]  ;;  %v923_v7 = vld [vmem:[%s1056_s1] sm:$0xff]  ;;  %s594_s26 = sshll.u32 %s820_s25, 4  ;;  %s596_s5 = sshll.u32 %s1064_s9, 4  ;;  %s595_s26 = int_to_ptr.vmem [resolvable:$true] %s594_s26  ;;  %s597_s5 = int_to_ptr.hbm [resolvable:$true] %s596_s5 }
  0x16   :  { %124 = vmatpush.msra.mxu0 %v100_v1  ;;  %647 = vmatpush.msra.mxu3 %v915_v6  ;;  %v931_v8 = vld [vmem:[%s1056_s1 + $0x10] sm:$0xff]  ;;  %v933_v9 = vld [vmem:[#allocation2 + $0x8] sm:$0xff]  ;;  %s818_s1 = smov 32   ;;  %v205_v10 = vld [vmem:[%s1058_s3] sm:$0xf] }
  0x17   :  { %611 = vmatmul.msk.f32.vlgmr.msra.gmra.mxu0 %vm102_vm0, %v898_v2  ;;  %149 = vmatpush.msra.mxu1 %v132_v5  ;;  %v209_v11 = vld [vmem:[#allocation5 + $0x18] sm:$0xff]  ;;  %v208_v12 = vld [vmem:[#allocation5 + $0x10] sm:$0xff]  ;;  %v207_v13 = vld [vmem:[#allocation5 + $0x8] sm:$0xff] }
  0x18   :  { %173 = vmatpush.msrb.mxu0 %v903_v3  ;;  %613 = vmatmul.msk.f32.vlgmr.msra.gmra.mxu1 %vm102_vm0, %v898_v2  ;;  %v206_v14 = vld [vmem:[#allocation5] sm:$0xff] }
  0x19   :  { %646 = vmatpush.msra.mxu2 %v923_v7  ;;  %196 = vmatpush.msrb.mxu1 %v915_v6  ;;  %v658_v24 = vld [vmem:[#allocation7] ss:$0 sm:$0xff] }
  0x1a   :  { %174 = vmatpush.msrb.mxu0 %v923_v7  ;;  %616 = vmatmul.msk.f32.vlgmr.msra.gmra.mxu2 %vm102_vm0, %v933_v9 }
  0x1b   :  { %197 = vmatpush.msrb.mxu1 %v931_v8  ;;  %648 = vmatpush.msra.mxu3 %v931_v8 }
  0x1c   :  { %618 = vmatmul.msk.f32.vlgmr.msra.gmra.mxu3 %vm102_vm0, %v933_v9  ;;  %526 = vrot.lane.b32.xlu0 %v923_v7, %s818_s1 }
  0x1d   :  { %530 = vrot.lane.b32.xlu1 %v931_v8, %s818_s1  ;;  %623 = vmatpush.msk.msra.mxu1 %vm265_vm1, %v205_v10 }
  0x1e   :  { %235 = vmatpush.msra.mxu0 %v209_v11 }
  0x1f   :  { %612 = vmatmul.msk.f32.gmra.mxu0 %vm102_vm0, %v933_v9 }
  0x20   :  { %614 = vmatmul.msk.f32.gmra.mxu1 %vm102_vm0, %v933_v9  ;;  %236 = vmatpush.msra.mxu0 %v208_v12 }
  0x22   :  { %237 = vmatpush.msra.mxu0 %v207_v13 }
  0x24   :  { %528 = vrot.lane.b32.xlu0 %v903_v3, %s818_s1  ;;  %238 = vmatpush.msra.mxu0 %v206_v14 }
  0x25   :  { %532 = vrot.lane.b32.xlu1 %v915_v6, %s818_s1 }
  0x27   :  { %615 = vmatmul.msk.f32.vlgmr.msrb.gmra.mxu0 %vm102_vm0, %v898_v2 }
  0x28   :  { %617 = vmatmul.msk.f32.vlgmr.msrb.gmra.mxu1 %vm102_vm0, %v898_v2 }
  0x8e   :  { %v527_v63 = vpop.permute.xlu0 %526 }
  0x94   :  { %v964_v15 = vpop.f32.mrf.mxu0 }
  0x95   :  { %624 = vmatmul.msk.f32.vlgmr.msra.gmra.mxu1 %vm252_vm2, %v964_v15  ;;  %v972_v17 = vpop.f32.mrf.mxu1 }
  0x9c   :  { %v968_v16 = vpop.f32.mrf.mxu0 }
  0x9d   :  { %625 = vmatmul.msk.f32.gmra.mxu1 %vm252_vm2, %v968_v16  ;;  %v977_v19 = vpop.f32.mrf.mxu1  ;;  %v179_v20 = vpop.f32.mrf.mxu2 }
  0x9f   :  { %v202_v22 = vpop.f32.mrf.mxu3 }
  0xa4   :  { %v176_v18 = vpop.f32.mrf.mxu0 }
  0xa5   :  { %619 = vmatmul.msk.f32.vlgmr.msra.gmra.mxu0 %vm210_vm3, %v176_v18  ;;  %626 = vmatmul.msk.f32.gmra.mxu1 %vm252_vm2, %v972_v17  ;;  %v199_v21 = vpop.f32.mrf.mxu1 }
  0xad   :  { %620 = vmatmul.msk.f32.gmra.mxu0 %vm210_vm3, %v179_v20  ;;  %627 = vmatmul.msk.f32.gmra.mxu1 %vm252_vm2, %v977_v19 }
  0xb5   :  { %621 = vmatmul.msk.f32.gmra.mxu0 %vm210_vm3, %v199_v21 }
  0xbd   :  { %622 = vmatmul.msk.f32.gmra.mxu0 %vm210_vm3, %v202_v22 }
 0x112   :  { %v286_v23 = vpop.f32.mrf.mxu1 }
 0x11a   :  { %v289_v28 = vpop.f32.mrf.mxu1 }
 0x122   :  { %v240_v25 = vpop.f32.mrf.mxu0  ;;  %v292_v36 = vpop.f32.mrf.mxu1 }
 0x123   :  { %v287_v26 = vadd.f32 %v286_v23, %v240_v25 }
 0x125   :  { %v302_v27 = vadd.f32 %v658_v24, %v287_v26 }
 0x127   :  { %v628_v29 = vmul.f32 -1.442695, %v302_v27 }
 0x129   :  { %660 = vpow2.f32 %v628_v29 }
 0x12a   :  { %v243_v30 = vpop.f32.mrf.mxu0  ;;  %v295_v45 = vpop.f32.mrf.mxu1 }
 0x12b   :  { %v290_v31 = vadd.f32 %v289_v28, %v243_v30 }
 0x12d   :  { %v303_v32 = vadd.f32 %v658_v24, %v290_v31 }
 0x12f   :  { %v661_v33 = vpop.eup %660  ;;  %v629_v34 = vmul.f32 -1.442695, %v303_v32 }
 0x130   :  { %v318_v35 = vadd.f32 1.0, %v661_v33 }
 0x131   :  { %662 = vpow2.f32 %v629_v34 }
 0x132   :  { %664 = vrcp.f32 %v318_v35  ;;  %v246_v37 = vpop.f32.mrf.mxu0  ;;  %vm327_vm5 = vweird.f32 %v318_v35  ;;  %v333_v58 = vand.u32 2147483648, %v318_v35  ;;  %v331_v60 = vand.u32 2147483647, %v318_v35 }
 0x133   :  { %v293_v38 = vadd.f32 %v292_v36, %v246_v37 }
 0x134   :  { %v334_v11 = vor.u32 1.1754944e-38, %v333_v58  ;;  %vm332_vm10 = vcmp.eq.f32.partialorder %v331_v60, 8.507059e+37 }
 0x135   :  { %v304_v39 = vadd.f32 %v658_v24, %v293_v38 }
 0x137   :  { %v663_v40 = vpop.eup %662  ;;  %v630_v41 = vmul.f32 -1.442695, %v304_v39 }
 0x138   :  { %v665_v42 = vpop.eup %664  ;;  %v319_v43 = vadd.f32 1.0, %v663_v40 }
 0x139   :  { %666 = vpow2.f32 %v630_v41  ;;  %v323_v44 = vmul.f32 %v665_v42, %v318_v35  ;;  %vm328_vm4 = vweird.f32 %v665_v42  ;;  %v432_v41 = vld [vmem:[%s1061_s6] sm:$0xf] }
 0x13a   :  { %668 = vrcp.f32 %v319_v43  ;;  %v249_v46 = vpop.f32.mrf.mxu0  ;;  %v348_v59 = vand.u32 2147483648, %v319_v43  ;;  %v346_v62 = vand.u32 2147483647, %v319_v43  ;;  %vm984_vm7 = vmor %vm327_vm5, %vm328_vm4  ;;  %vm342_vm8 = vweird.f32 %v319_v43 }
 0x13b   :  { %v296_v47 = vadd.f32 %v295_v45, %v249_v46  ;;  %v324_v48 = vsub.f32 1.0, %v323_v44 }
 0x13c   :  { %v349_v12 = vor.u32 1.1754944e-38, %v348_v59  ;;  %vm347_vm11 = vcmp.eq.f32.partialorder %v346_v62, 8.507059e+37 }
 0x13d   :  { %v305_v49 = vadd.f32 %v658_v24, %v296_v47  ;;  %v325_v52 = vmul.f32 %v665_v42, %v324_v48 }
 0x13f   :  { %v667_v50 = vpop.eup %666  ;;  %v631_v51 = vmul.f32 -1.442695, %v305_v49  ;;  %v326_v56 = vadd.f32 %v665_v42, %v325_v52 }
 0x140   :  { %v669_v53 = vpop.eup %668  ;;  %v320_v54 = vadd.f32 1.0, %v667_v50 }
 0x141   :  { %670 = vpow2.f32 %v631_v51  ;;  %v338_v55 = vmul.f32 %v669_v53, %v319_v43  ;;  %vm343_vm6 = vweird.f32 %v669_v53  ;;  %v330_v1 = vsel %vm984_vm7, %v665_v42, %v326_v56  ;;  %v436_v42 = vld [vmem:[#allocation8 + $0x18] sm:$0xff]  ;;  %v435_v43 = vld [vmem:[#allocation8 + $0x10] sm:$0xff] }
 0x142   :  { %672 = vrcp.f32 %v320_v54  ;;  %vm344_vm9 = vmor %vm342_vm8, %vm343_vm6  ;;  %v990_v18 = vsel %vm332_vm10, %v334_v11, %v330_v1  ;;  %vm357_vm13 = vweird.f32 %v320_v54  ;;  %v363_v29 = vand.u32 2147483648, %v320_v54  ;;  %v529_v11 = vpop.permute.xlu0 %528 }
 0x143   :  { %v339_v57 = vsub.f32 1.0, %v338_v55  ;;  %v382_v23 = vmul.f32 %v990_v18, %v923_v7  ;;  %v361_v31 = vand.u32 2147483647, %v320_v54 }
 0x144   :  { %v364_v34 = vor.u32 1.1754944e-38, %v363_v29 }
 0x145   :  { %v340_v61 = vmul.f32 %v669_v53, %v339_v57  ;;  %vm362_vm6 = vcmp.eq.f32.partialorder %v361_v31, 8.507059e+37 }
 0x147   :  { %v671_v0 = vpop.eup %670  ;;  %v341_v4 = vadd.f32 %v669_v53, %v340_v61 }
 0x148   :  { %v673_v5 = vpop.eup %672  ;;  %v321_v10 = vadd.f32 1.0, %v671_v0  ;;  %v542_v0 = vsub.f32 1.0, %v990_v18 }
 0x149   :  { %v345_v13 = vsel %vm344_vm9, %v669_v53, %v341_v4  ;;  %v353_v14 = vmul.f32 %v673_v5, %v320_v54  ;;  %vm358_vm12 = vweird.f32 %v673_v5  ;;  %v538_v4 = vmul.f32 %v527_v63, %v990_v18 }
 0x14a   :  { %674 = vrcp.f32 %v321_v10  ;;  %v992_v20 = vsel %vm347_vm11, %v349_v12, %v345_v13  ;;  %v378_v30 = vand.u32 2147483648, %v321_v10  ;;  %v376_v32 = vand.u32 2147483647, %v321_v10  ;;  %vm359_vm15 = vmor %vm357_vm13, %vm358_vm12 }
 0x14b   :  { %v383_v21 = vmul.f32 %v992_v20, %v903_v3  ;;  %v354_v22 = vsub.f32 1.0, %v353_v14  ;;  %vm372_vm4 = vweird.f32 %v321_v10  ;;  %v543_v12 = vsub.f32 1.0, %v992_v20 }
 0x14c   :  { %v379_v35 = vor.u32 1.1754944e-38, %v378_v30  ;;  %vm377_vm7 = vcmp.eq.f32.partialorder %v376_v32, 8.507059e+37  ;;  %v539_v14 = vmul.f32 %v529_v11, %v992_v20 }
 0x14d   :  { %400 = vmatpush.msrb.mxu2 %v383_v21  ;;  %v355_v24 = vmul.f32 %v673_v5, %v354_v22 }
 0x14f   :  { %401 = vmatpush.msrb.mxu2 %v382_v23  ;;  %v356_v27 = vadd.f32 %v673_v5, %v355_v24  ;;  %v531_v23 = vpop.permute.xlu1 %530 }
 0x150   :  { %v675_v25 = vpop.eup %674  ;;  %632 = vmatmul.msk.f32.vlgmr.msrb.gmra.mxu2 %vm102_vm0, %v898_v2 }
 0x151   :  { %v368_v26 = vmul.f32 %v675_v25, %v321_v10  ;;  %vm373_vm14 = vweird.f32 %v675_v25  ;;  %v360_v33 = vsel %vm359_vm15, %v673_v5, %v356_v27  ;;  %461 = vmatpush.msra.mxu2 %v436_v42 }
 0x152   :  { %vm374_vm5 = vmor %vm372_vm4, %vm373_vm14  ;;  %v1002_v37 = vsel %vm362_vm6, %v364_v34, %v360_v33 }
 0x153   :  { %v369_v28 = vsub.f32 1.0, %v368_v26  ;;  %v384_v40 = vmul.f32 %v1002_v37, %v931_v8  ;;  %462 = vmatpush.msra.mxu2 %v435_v43  ;;  %v544_v24 = vsub.f32 1.0, %v1002_v37  ;;  %v540_v18 = vmul.f32 %v531_v23, %v1002_v37 }
 0x155   :  { %v370_v3 = vmul.f32 %v675_v25, %v369_v28 }
 0x157   :  { %v371_v7 = vadd.f32 %v675_v25, %v370_v3 }
 0x158   :  { %633 = vmatmul.msk.f32.gmra.mxu2 %vm102_vm0, %v933_v9 }
 0x159   :  { %v375_v36 = vsel %vm374_vm5, %v675_v25, %v371_v7  ;;  %v533_v25 = vpop.permute.xlu1 %532 }
 0x15a   :  { %v1004_v38 = vsel %vm377_vm7, %v379_v35, %v375_v36 }
 0x15b   :  { %v385_v39 = vmul.f32 %v1004_v38, %v915_v6  ;;  %v434_v6 = vld [vmem:[#allocation8 + $0x8] sm:$0xff]  ;;  %v545_v29 = vsub.f32 1.0, %v1004_v38  ;;  %v541_v31 = vmul.f32 %v533_v25, %v1004_v38 }
 0x15c   :  { %463 = vmatpush.msra.mxu2 %v434_v6 }
 0x15d   :  { %423 = vmatpush.msrb.mxu3 %v385_v39 }
 0x15f   :  { %424 = vmatpush.msrb.mxu3 %v384_v40 }
 0x160   :  { %634 = vmatmul.msk.f32.vlgmr.msrb.gmra.mxu3 %vm102_vm0, %v898_v2  ;;  %v433_v2 = vld [vmem:[#allocation8] sm:$0xff] }
 0x161   :  { %640 = vmatpush.msk.msra.mxu3 %vm265_vm1, %v432_v41  ;;  %464 = vmatpush.msra.mxu2 %v433_v2 }
 0x168   :  { %635 = vmatmul.msk.f32.gmra.mxu3 %vm102_vm0, %v933_v9 }
 0x170   :  { %641 = vmatmul.msk.f32.vlgmr.msra.gmra.mxu3 %vm252_vm2, %v964_v15 }
 0x178   :  { %642 = vmatmul.msk.f32.gmra.mxu3 %vm252_vm2, %v968_v16 }
 0x180   :  { %643 = vmatmul.msk.f32.gmra.mxu3 %vm252_vm2, %v972_v17  ;;  %v659_v17 = vld [vmem:[%s1063_s8] ss:$0 sm:$0xff]  ;;  %s819_s8 = smov 96  }
 0x188   :  { %644 = vmatmul.msk.f32.gmra.mxu3 %vm252_vm2, %v977_v19 }
 0x1d3   :  { %v403_v8 = vpop.f32.mrf.mxu2 }
 0x1d4   :  { %636 = vmatmul.msk.f32.vlgmr.msra.gmra.mxu2 %vm210_vm3, %v403_v8 }
 0x1db   :  { %v406_v9 = vpop.f32.mrf.mxu2 }
 0x1dc   :  { %637 = vmatmul.msk.f32.gmra.mxu2 %vm210_vm3, %v406_v9 }
 0x1e3   :  { %v426_v44 = vpop.f32.mrf.mxu3 }
 0x1e4   :  { %638 = vmatmul.msk.f32.gmra.mxu2 %vm210_vm3, %v426_v44 }
 0x1eb   :  { %v429_v15 = vpop.f32.mrf.mxu3 }
 0x1ec   :  { %639 = vmatmul.msk.f32.gmra.mxu2 %vm210_vm3, %v429_v15 }
 0x1f3   :  { %v498_v16 = vpop.f32.mrf.mxu3 }
 0x1fb   :  { %v501_v47 = vpop.f32.mrf.mxu3 }
 0x203   :  { %v504_v52 = vpop.f32.mrf.mxu3 }
 0x20b   :  { %v507_v57 = vpop.f32.mrf.mxu3 }
 0x257   :  { %v466_v19 = vpop.f32.mrf.mxu2 }
 0x258   :  { %v499_v45 = vadd.f32 %v498_v16, %v466_v19 }
 0x25a   :  { %v514_v46 = vadd.f32 %v659_v17, %v499_v45 }
 0x25c   :  { %676 = vtanh.f32 %v514_v46 }
 0x25f   :  { %v469_v48 = vpop.f32.mrf.mxu2 }
 0x260   :  { %v502_v49 = vadd.f32 %v501_v47, %v469_v48 }
 0x262   :  { %v677_v50 = vpop.eup %676  ;;  %v515_v51 = vadd.f32 %v659_v17, %v502_v49 }
 0x263   :  { %550 = vrot.lane.b32.xlu2 %v677_v50, %s818_s1 }
 0x264   :  { %678 = vtanh.f32 %v515_v51 }
 0x267   :  { %v472_v53 = vpop.f32.mrf.mxu2 }
 0x268   :  { %v505_v54 = vadd.f32 %v504_v52, %v472_v53 }
 0x26a   :  { %v679_v55 = vpop.eup %678  ;;  %v516_v56 = vadd.f32 %v659_v17, %v505_v54 }
 0x26b   :  { %552 = vrot.lane.b32.xlu2 %v679_v55, %s818_s1 }
 0x26c   :  { %680 = vtanh.f32 %v516_v56 }
 0x26f   :  { %v475_v58 = vpop.f32.mrf.mxu2 }
 0x270   :  { %v508_v59 = vadd.f32 %v507_v57, %v475_v58 }
 0x272   :  { %v681_v60 = vpop.eup %680  ;;  %v517_v61 = vadd.f32 %v659_v17, %v508_v59 }
 0x273   :  { %554 = vrot.lane.b32.xlu0 %v681_v60, %s818_s1 }
 0x274   :  { %682 = vtanh.f32 %v517_v61 }
 0x27a   :  { %v683_v62 = vpop.eup %682 }
 0x27b   :  { %556 = vrot.lane.b32.xlu1 %v683_v62, %s818_s1 }
 0x2bd   :  { %v551_v1 = vpop.permute.xlu2 %550 }
 0x2be   :  { %v562_v5 = vmul.f32 %v551_v1, %v542_v0 }
 0x2c0   :  { %v566_v10 = vadd.f32 %v562_v5, %v538_v4 }
 0x2c2   :  { %574 = vrot.lane.b32.xlu2 %v566_v10, %s819_s8 }
 0x2c5   :  { %v553_v13 = vpop.permute.xlu2 %552 }
 0x2c6   :  { %v563_v21 = vmul.f32 %v553_v13, %v543_v12 }
 0x2c8   :  { %v567_v22 = vadd.f32 %v563_v21, %v539_v14 }
 0x2ca   :  { %576 = vrot.lane.b32.xlu0 %v567_v22, %s819_s8 }
 0x2e5   :  { %v555_v26 = vpop.permute.xlu0 %554 }
 0x2e6   :  { %v564_v27 = vmul.f32 %v555_v26, %v544_v24 }
 0x2e8   :  { %v568_v28 = vadd.f32 %v564_v27, %v540_v18 }
 0x2ea   :  { %578 = vrot.lane.b32.xlu1 %v568_v28, %s819_s8 }
 0x2ed   :  { %v557_v30 = vpop.permute.xlu1 %556 }
 0x2ee   :  { %v565_v3 = vmul.f32 %v557_v30, %v545_v29 }
 0x2f0   :  { %v569_v20 = vadd.f32 %v565_v3, %v541_v31 }
 0x2f2   :  { %580 = vrot.lane.b32.xlu2 %v569_v20, %s819_s8 }
 0x31c   :  { %v575_v32 = vpop.permute.xlu2 %574 }
 0x31d   :  { %586 = vst.msk [vmem:[#allocation10] sm:$0xff] %vm210_vm3, %v575_v32 }
 0x33c   :  { %v577_v33 = vpop.permute.xlu0 %576 }
 0x33d   :  { %587 = vst.msk [vmem:[#allocation10 + $0x8] sm:$0xff] %vm210_vm3, %v577_v33 }
 0x34c   :  { %v581_v7 = vpop.permute.xlu2 %580 }
 0x34d   :  { %589 = vst.msk [vmem:[#allocation10 + $0x18] sm:$0xff] %vm210_vm3, %v581_v7 }
 0x35c   :  { %v579_v34 = vpop.permute.xlu1 %578 }
 0x35d   :  { %588 = vst.msk [vmem:[#allocation10 + $0x10] sm:$0xff] %vm210_vm3, %v579_v34 }
 0x35e   :  { %602 = dma.vmem_to_hbm [thread:$0]  %s595_s26, 512, %s597_s5, [#allocation4], %s813_s17, %s813_s17, %s814_s18  }
 0x35f   :  { %810 = dma.done.wait [#allocation4], 512  }
 0x360   :  { %811 = vsyncadd [#allocation4], 4294966784 }
 0x361   :  { %607 = vsyncpa [#allocation3], 1 }
 0x362   :  { %608 = vsyncpa [#allocation6], 1 }
 0x363   :  { %609 = vsyncpa [#allocation9], 1 }
 0x364   :  { %610 = vsyncpa [#allocation4], 1 }

</bundles_post_ra>
